<compile_context>
chip_gen: v6e
topology: v6e:2x2x1
jax: 0.10.0
libtpu: 0.0.40
codegen_flags: <defaults>
</compile_context>

<pallas_src>
import jax
import jax.numpy as jnp
import numpy as np
from jax import lax
from jax.experimental import pallas as pl
from jax.experimental.pallas import tpu as pltpu


def _round_up(x, m):
    return ((x + m - 1) // m) * m


def encoder_kernel(ar_ref, m_ref, bsum_ref, wout_ref, bout_ref, o_ref):
    """Single-shot fused forward.

    ar_ref   : [B, L]       int32  (VMEM)
    m_ref    : [L, Vk, H4]  bf16   (VMEM)  M_l = E @ W_l, rows >= V zero-padded
    bsum_ref : [1, H4]      f32
    wout_ref : [H4, Vp]     bf16   (zero-padded output weight)
    bout_ref : [1, Vp]      f32    (zero-padded output bias)
    o_ref    : [B, Vp]      f32    lane-dense output
    """
    B, L = ar_ref.shape
    _, Vk, H4 = m_ref.shape

    ids = ar_ref[...]                                   # [B, L] int32
    acc = jnp.zeros((B, H4), jnp.float32)

    # Gather-as-matmul: per position, one-hot(ar[:, l]) @ M_l on the MXU.
    for l in range(L):
        onehot = (
            ids[:, l : l + 1]
            == lax.broadcasted_iota(jnp.int32, (B, Vk), 1)
        ).astype(m_ref.dtype)                            # [B, Vk] bf16 (0/1 exact)
        acc = acc + jnp.dot(
            onehot, m_ref[l], preferred_element_type=jnp.float32
        )                                                # [B, H4] f32 accum

    x = acc + bsum_ref[...]                              # f32 bias add (VPU)

    # out = x @ W_out_pad + b_out_pad     [B, H4] @ [H4, Vp] + [1, Vp]
    o_ref[...] = (
        jnp.dot(
            x.astype(wout_ref.dtype),
            wout_ref[...],
            preferred_element_type=jnp.float32,
        )
        + bout_ref[...]
    ).astype(o_ref.dtype)


def prepare_params(emb_table, fc_w, fc_b, out_w, out_b):
    """One-time, init-time parameter preprocessing (not on the per-call path).

    emb_table: [V, H]      fc_w: [L, H, 4H]   fc_b: [L, 4H]
    out_w:     [4H, V]     out_b: [V]
    """
    V, H = emb_table.shape
    L, _, H4 = fc_w.shape
    Vk = max(128, _round_up(V, 128))   # one-hot contraction dim (MXU K tile)
    Vp = max(128, _round_up(V, 128))   # lane-dense output dim

    # Fold embedding into per-position weights: M_l = E @ W_l   -> [L, V, H4]
    m = jnp.einsum(
        "vh,lhf->lvf",
        emb_table.astype(jnp.float32),
        fc_w.astype(jnp.float32),
    )
    m_pad = jnp.zeros((L, Vk, H4), jnp.float32).at[:, :V, :].set(m)

    b_sum = fc_b.sum(axis=0).reshape(1, H4).astype(jnp.float32)
    out_w_p = jnp.zeros((H4, Vp), jnp.float32).at[:, :V].set(out_w)
    out_b_p = jnp.zeros((1, Vp), jnp.float32).at[0, :V].set(out_b)

    return {
        "m": m_pad.astype(jnp.bfloat16),      # MXU operand -> bf16
        "b_sum": b_sum,                        # bias adds stay f32
        "out_w": out_w_p.astype(jnp.bfloat16),
        "out_b": out_b_p,
    }


def encoder_forward(ar, params):
    """Per-call path: a single pallas_call, no wrapper XLA ops.

    Returns the lane-dense padded logits [B, Vp] (slice [:, :V] lazily where
    consumed, outside the hot path).
    """
    B, _ = ar.shape
    Vp = params["out_w"].shape[1]
    vmem = pl.BlockSpec(memory_space=pltpu.MemorySpace.VMEM)

    return pl.pallas_call(
        encoder_kernel,
        out_shape=jax.ShapeDtypeStruct((B, Vp), jnp.float32),
        in_specs=[vmem, vmem, vmem, vmem, vmem],
        out_specs=vmem,
    )(ar, params["m"], params["b_sum"], params["out_w"], params["out_b"])


def reference_forward(ar, emb_table, fc_w, fc_b, out_w, out_b):
    emb = emb_table[ar].astype(jnp.float32)                      # [B, L, H]
    x = jnp.einsum("blh,lhf->bf", emb, fc_w) + fc_b.sum(axis=0)  # [B, 4H]
    return x @ out_w + out_b                                     # [B, V]


if __name__ == "__main__":
    # Small, TPU-friendly shapes consistent with the module's forward.
    B = 8              # batch
    H = 32             # hidden_dim
    H4 = 4 * H         # 128
    V = 61             # vocab_size
    L = 10             # context_length

    key = jax.random.PRNGKey(0)
    k_emb, k_w, k_b, k_ow, k_ob, k_ar = jax.random.split(key, 6)

    # Deterministic synthetic parameters (PyTorch Linear weight is [out, in];
    # we store the transposed [in, out] form for the kernel's row-major matmul).
    emb_table = jax.random.normal(k_emb, (V, H), dtype=jnp.float32) * 0.1
    fc_w = jax.random.normal(k_w, (L, H, H4), dtype=jnp.float32) * 0.05
    fc_b = jax.random.normal(k_b, (L, H4), dtype=jnp.float32) * 0.05
    out_w = jax.random.normal(k_ow, (H4, V), dtype=jnp.float32) * 0.05
    out_b = jax.random.normal(k_ob, (V,), dtype=jnp.float32) * 0.05

    ar = jax.random.randint(k_ar, (B, L), 0, V, dtype=jnp.int32)

    # Init-time prep (done once), then the per-call forward.
    params = prepare_params(emb_table, fc_w, fc_b, out_w, out_b)
    params = jax.tree_util.tree_map(jax.block_until_ready, params)

    out_padded = encoder_forward(ar, params)            # [B, 128] lane-dense
    out_padded = jax.block_until_ready(out_padded)

    out = np.asarray(out_padded)[:, :V]                  # test-only slice
    ref = np.asarray(
        reference_forward(ar, emb_table, fc_w, fc_b, out_w, out_b)
    )
    assert out.shape == (B, V)
    # bf16 MXU operands -> relaxed tolerance vs. the f32 reference.
    np.testing.assert_allclose(out, ref, rtol=2e-2, atol=2e-2)

    print("KERNEL_OK")
</pallas_src>

<mosaic_0001>
module attributes {stable_mosaic.version = 11 : i64} {
  func.func @encoder_kernel(%arg0: memref<8x10xi32, #tpu.memory_space<vmem>>, %arg1: memref<10x128x128xbf16, #tpu.memory_space<vmem>>, %arg2: memref<1x128xf32, #tpu.memory_space<vmem>>, %arg3: memref<128x128xbf16, #tpu.memory_space<vmem>>, %arg4: memref<1x128xf32, #tpu.memory_space<vmem>>, %arg5: memref<8x128xf32, #tpu.memory_space<vmem>>) attributes {dimension_semantics = [], scalar_prefetch = 0 : i64, scratch_operands = 0 : i64, tpu.core_type = #tpu.core_type<tc>} {
    %c0 = arith.constant 0 : index
    %c0_0 = arith.constant 0 : index
    %0 = vector.load %arg0[%c0, %c0_0] : memref<8x10xi32, #tpu.memory_space<vmem>>, vector<8x10xi32>
    %cst = arith.constant 0.000000e+00 : f32
    %1 = vector.broadcast %cst : f32 to vector<8x128xf32>
    %2 = vector.extract_strided_slice %0 {offsets = [0, 0], sizes = [8, 1], strides = [1, 1]} : vector<8x10xi32> to vector<8x1xi32>
    %3 = tpu.iota {dimensions = array<i32: 1>} : vector<8x128xi32>
    %4 = vector.broadcast %2 : vector<8x1xi32> to vector<8x128xi32>
    %5 = arith.cmpi eq, %4, %3 : vector<8x128xi32>
    %6 = arith.extui %5 : vector<8x128xi1> to vector<8x128xi32>
    %7 = arith.sitofp %6 : vector<8x128xi32> to vector<8x128xf32>
    %8 = arith.truncf %7 : vector<8x128xf32> to vector<8x128xbf16>
    %c0_1 = arith.constant 0 : index
    %c0_2 = arith.constant 0 : index
    %c0_3 = arith.constant 0 : index
    %9 = vector.load %arg1[%c0_1, %c0_2, %c0_3] : memref<10x128x128xbf16, #tpu.memory_space<vmem>>, vector<1x128x128xbf16>
    %10 = vector.shape_cast %9 : vector<1x128x128xbf16> to vector<128x128xbf16>
    %cst_4 = arith.constant dense<0.000000e+00> : vector<8x128xf32>
    %11 = tpu.matmul %8, %10, %cst_4 {dimension_numbers = #tpu.dot_dimension_numbers<[1], [0], [0], [1], [0, 0, 1, 1], [], []>} : vector<8x128xbf16>, vector<128x128xbf16>, vector<8x128xf32> -> vector<8x128xf32>
    %12 = arith.addf %1, %11 : vector<8x128xf32>
    %13 = vector.extract_strided_slice %0 {offsets = [0, 1], sizes = [8, 1], strides = [1, 1]} : vector<8x10xi32> to vector<8x1xi32>
    %14 = tpu.iota {dimensions = array<i32: 1>} : vector<8x128xi32>
    %15 = vector.broadcast %13 : vector<8x1xi32> to vector<8x128xi32>
    %16 = arith.cmpi eq, %15, %14 : vector<8x128xi32>
    %17 = arith.extui %16 : vector<8x128xi1> to vector<8x128xi32>
    %18 = arith.sitofp %17 : vector<8x128xi32> to vector<8x128xf32>
    %19 = arith.truncf %18 : vector<8x128xf32> to vector<8x128xbf16>
    %c1 = arith.constant 1 : index
    %c0_5 = arith.constant 0 : index
    %c0_6 = arith.constant 0 : index
    %20 = vector.load %arg1[%c1, %c0_5, %c0_6] : memref<10x128x128xbf16, #tpu.memory_space<vmem>>, vector<1x128x128xbf16>
    %21 = vector.shape_cast %20 : vector<1x128x128xbf16> to vector<128x128xbf16>
    %cst_7 = arith.constant dense<0.000000e+00> : vector<8x128xf32>
    %22 = tpu.matmul %19, %21, %cst_7 {dimension_numbers = #tpu.dot_dimension_numbers<[1], [0], [0], [1], [0, 0, 1, 1], [], []>} : vector<8x128xbf16>, vector<128x128xbf16>, vector<8x128xf32> -> vector<8x128xf32>
    %23 = arith.addf %12, %22 : vector<8x128xf32>
    %24 = vector.extract_strided_slice %0 {offsets = [0, 2], sizes = [8, 1], strides = [1, 1]} : vector<8x10xi32> to vector<8x1xi32>
    %25 = tpu.iota {dimensions = array<i32: 1>} : vector<8x128xi32>
    %26 = vector.broadcast %24 : vector<8x1xi32> to vector<8x128xi32>
    %27 = arith.cmpi eq, %26, %25 : vector<8x128xi32>
    %28 = arith.extui %27 : vector<8x128xi1> to vector<8x128xi32>
    %29 = arith.sitofp %28 : vector<8x128xi32> to vector<8x128xf32>
    %30 = arith.truncf %29 : vector<8x128xf32> to vector<8x128xbf16>
    %c2 = arith.constant 2 : index
    %c0_8 = arith.constant 0 : index
    %c0_9 = arith.constant 0 : index
    %31 = vector.load %arg1[%c2, %c0_8, %c0_9] : memref<10x128x128xbf16, #tpu.memory_space<vmem>>, vector<1x128x128xbf16>
    %32 = vector.shape_cast %31 : vector<1x128x128xbf16> to vector<128x128xbf16>
    %cst_10 = arith.constant dense<0.000000e+00> : vector<8x128xf32>
    %33 = tpu.matmul %30, %32, %cst_10 {dimension_numbers = #tpu.dot_dimension_numbers<[1], [0], [0], [1], [0, 0, 1, 1], [], []>} : vector<8x128xbf16>, vector<128x128xbf16>, vector<8x128xf32> -> vector<8x128xf32>
    %34 = arith.addf %23, %33 : vector<8x128xf32>
    %35 = vector.extract_strided_slice %0 {offsets = [0, 3], sizes = [8, 1], strides = [1, 1]} : vector<8x10xi32> to vector<8x1xi32>
    %36 = tpu.iota {dimensions = array<i32: 1>} : vector<8x128xi32>
    %37 = vector.broadcast %35 : vector<8x1xi32> to vector<8x128xi32>
    %38 = arith.cmpi eq, %37, %36 : vector<8x128xi32>
    %39 = arith.extui %38 : vector<8x128xi1> to vector<8x128xi32>
    %40 = arith.sitofp %39 : vector<8x128xi32> to vector<8x128xf32>
    %41 = arith.truncf %40 : vector<8x128xf32> to vector<8x128xbf16>
    %c3 = arith.constant 3 : index
    %c0_11 = arith.constant 0 : index
    %c0_12 = arith.constant 0 : index
    %42 = vector.load %arg1[%c3, %c0_11, %c0_12] : memref<10x128x128xbf16, #tpu.memory_space<vmem>>, vector<1x128x128xbf16>
    %43 = vector.shape_cast %42 : vector<1x128x128xbf16> to vector<128x128xbf16>
    %cst_13 = arith.constant dense<0.000000e+00> : vector<8x128xf32>
    %44 = tpu.matmul %41, %43, %cst_13 {dimension_numbers = #tpu.dot_dimension_numbers<[1], [0], [0], [1], [0, 0, 1, 1], [], []>} : vector<8x128xbf16>, vector<128x128xbf16>, vector<8x128xf32> -> vector<8x128xf32>
    %45 = arith.addf %34, %44 : vector<8x128xf32>
    %46 = vector.extract_strided_slice %0 {offsets = [0, 4], sizes = [8, 1], strides = [1, 1]} : vector<8x10xi32> to vector<8x1xi32>
    %47 = tpu.iota {dimensions = array<i32: 1>} : vector<8x128xi32>
    %48 = vector.broadcast %46 : vector<8x1xi32> to vector<8x128xi32>
    %49 = arith.cmpi eq, %48, %47 : vector<8x128xi32>
    %50 = arith.extui %49 : vector<8x128xi1> to vector<8x128xi32>
    %51 = arith.sitofp %50 : vector<8x128xi32> to vector<8x128xf32>
    %52 = arith.truncf %51 : vector<8x128xf32> to vector<8x128xbf16>
    %c4 = arith.constant 4 : index
    %c0_14 = arith.constant 0 : index
    %c0_15 = arith.constant 0 : index
    %53 = vector.load %arg1[%c4, %c0_14, %c0_15] : memref<10x128x128xbf16, #tpu.memory_space<vmem>>, vector<1x128x128xbf16>
    %54 = vector.shape_cast %53 : vector<1x128x128xbf16> to vector<128x128xbf16>
    %cst_16 = arith.constant dense<0.000000e+00> : vector<8x128xf32>
    %55 = tpu.matmul %52, %54, %cst_16 {dimension_numbers = #tpu.dot_dimension_numbers<[1], [0], [0], [1], [0, 0, 1, 1], [], []>} : vector<8x128xbf16>, vector<128x128xbf16>, vector<8x128xf32> -> vector<8x128xf32>
    %56 = arith.addf %45, %55 : vector<8x128xf32>
    %57 = vector.extract_strided_slice %0 {offsets = [0, 5], sizes = [8, 1], strides = [1, 1]} : vector<8x10xi32> to vector<8x1xi32>
    %58 = tpu.iota {dimensions = array<i32: 1>} : vector<8x128xi32>
    %59 = vector.broadcast %57 : vector<8x1xi32> to vector<8x128xi32>
    %60 = arith.cmpi eq, %59, %58 : vector<8x128xi32>
    %61 = arith.extui %60 : vector<8x128xi1> to vector<8x128xi32>
    %62 = arith.sitofp %61 : vector<8x128xi32> to vector<8x128xf32>
    %63 = arith.truncf %62 : vector<8x128xf32> to vector<8x128xbf16>
    %c5 = arith.constant 5 : index
    %c0_17 = arith.constant 0 : index
    %c0_18 = arith.constant 0 : index
    %64 = vector.load %arg1[%c5, %c0_17, %c0_18] : memref<10x128x128xbf16, #tpu.memory_space<vmem>>, vector<1x128x128xbf16>
    %65 = vector.shape_cast %64 : vector<1x128x128xbf16> to vector<128x128xbf16>
    %cst_19 = arith.constant dense<0.000000e+00> : vector<8x128xf32>
    %66 = tpu.matmul %63, %65, %cst_19 {dimension_numbers = #tpu.dot_dimension_numbers<[1], [0], [0], [1], [0, 0, 1, 1], [], []>} : vector<8x128xbf16>, vector<128x128xbf16>, vector<8x128xf32> -> vector<8x128xf32>
    %67 = arith.addf %56, %66 : vector<8x128xf32>
    %68 = vector.extract_strided_slice %0 {offsets = [0, 6], sizes = [8, 1], strides = [1, 1]} : vector<8x10xi32> to vector<8x1xi32>
    %69 = tpu.iota {dimensions = array<i32: 1>} : vector<8x128xi32>
    %70 = vector.broadcast %68 : vector<8x1xi32> to vector<8x128xi32>
    %71 = arith.cmpi eq, %70, %69 : vector<8x128xi32>
    %72 = arith.extui %71 : vector<8x128xi1> to vector<8x128xi32>
    %73 = arith.sitofp %72 : vector<8x128xi32> to vector<8x128xf32>
    %74 = arith.truncf %73 : vector<8x128xf32> to vector<8x128xbf16>
    %c6 = arith.constant 6 : index
    %c0_20 = arith.constant 0 : index
    %c0_21 = arith.constant 0 : index
    %75 = vector.load %arg1[%c6, %c0_20, %c0_21] : memref<10x128x128xbf16, #tpu.memory_space<vmem>>, vector<1x128x128xbf16>
    %76 = vector.shape_cast %75 : vector<1x128x128xbf16> to vector<128x128xbf16>
    %cst_22 = arith.constant dense<0.000000e+00> : vector<8x128xf32>
    %77 = tpu.matmul %74, %76, %cst_22 {dimension_numbers = #tpu.dot_dimension_numbers<[1], [0], [0], [1], [0, 0, 1, 1], [], []>} : vector<8x128xbf16>, vector<128x128xbf16>, vector<8x128xf32> -> vector<8x128xf32>
    %78 = arith.addf %67, %77 : vector<8x128xf32>
    %79 = vector.extract_strided_slice %0 {offsets = [0, 7], sizes = [8, 1], strides = [1, 1]} : vector<8x10xi32> to vector<8x1xi32>
    %80 = tpu.iota {dimensions = array<i32: 1>} : vector<8x128xi32>
    %81 = vector.broadcast %79 : vector<8x1xi32> to vector<8x128xi32>
    %82 = arith.cmpi eq, %81, %80 : vector<8x128xi32>
    %83 = arith.extui %82 : vector<8x128xi1> to vector<8x128xi32>
    %84 = arith.sitofp %83 : vector<8x128xi32> to vector<8x128xf32>
    %85 = arith.truncf %84 : vector<8x128xf32> to vector<8x128xbf16>
    %c7 = arith.constant 7 : index
    %c0_23 = arith.constant 0 : index
    %c0_24 = arith.constant 0 : index
    %86 = vector.load %arg1[%c7, %c0_23, %c0_24] : memref<10x128x128xbf16, #tpu.memory_space<vmem>>, vector<1x128x128xbf16>
    %87 = vector.shape_cast %86 : vector<1x128x128xbf16> to vector<128x128xbf16>
    %cst_25 = arith.constant dense<0.000000e+00> : vector<8x128xf32>
    %88 = tpu.matmul %85, %87, %cst_25 {dimension_numbers = #tpu.dot_dimension_numbers<[1], [0], [0], [1], [0, 0, 1, 1], [], []>} : vector<8x128xbf16>, vector<128x128xbf16>, vector<8x128xf32> -> vector<8x128xf32>
    %89 = arith.addf %78, %88 : vector<8x128xf32>
    %90 = vector.extract_strided_slice %0 {offsets = [0, 8], sizes = [8, 1], strides = [1, 1]} : vector<8x10xi32> to vector<8x1xi32>
    %91 = tpu.iota {dimensions = array<i32: 1>} : vector<8x128xi32>
    %92 = vector.broadcast %90 : vector<8x1xi32> to vector<8x128xi32>
    %93 = arith.cmpi eq, %92, %91 : vector<8x128xi32>
    %94 = arith.extui %93 : vector<8x128xi1> to vector<8x128xi32>
    %95 = arith.sitofp %94 : vector<8x128xi32> to vector<8x128xf32>
    %96 = arith.truncf %95 : vector<8x128xf32> to vector<8x128xbf16>
    %c8 = arith.constant 8 : index
    %c0_26 = arith.constant 0 : index
    %c0_27 = arith.constant 0 : index
    %97 = vector.load %arg1[%c8, %c0_26, %c0_27] : memref<10x128x128xbf16, #tpu.memory_space<vmem>>, vector<1x128x128xbf16>
    %98 = vector.shape_cast %97 : vector<1x128x128xbf16> to vector<128x128xbf16>
    %cst_28 = arith.constant dense<0.000000e+00> : vector<8x128xf32>
    %99 = tpu.matmul %96, %98, %cst_28 {dimension_numbers = #tpu.dot_dimension_numbers<[1], [0], [0], [1], [0, 0, 1, 1], [], []>} : vector<8x128xbf16>, vector<128x128xbf16>, vector<8x128xf32> -> vector<8x128xf32>
    %100 = arith.addf %89, %99 : vector<8x128xf32>
    %101 = vector.extract_strided_slice %0 {offsets = [0, 9], sizes = [8, 1], strides = [1, 1]} : vector<8x10xi32> to vector<8x1xi32>
    %102 = tpu.iota {dimensions = array<i32: 1>} : vector<8x128xi32>
    %103 = vector.broadcast %101 : vector<8x1xi32> to vector<8x128xi32>
    %104 = arith.cmpi eq, %103, %102 : vector<8x128xi32>
    %105 = arith.extui %104 : vector<8x128xi1> to vector<8x128xi32>
    %106 = arith.sitofp %105 : vector<8x128xi32> to vector<8x128xf32>
    %107 = arith.truncf %106 : vector<8x128xf32> to vector<8x128xbf16>
    %c9 = arith.constant 9 : index
    %c0_29 = arith.constant 0 : index
    %c0_30 = arith.constant 0 : index
    %108 = vector.load %arg1[%c9, %c0_29, %c0_30] : memref<10x128x128xbf16, #tpu.memory_space<vmem>>, vector<1x128x128xbf16>
    %109 = vector.shape_cast %108 : vector<1x128x128xbf16> to vector<128x128xbf16>
    %cst_31 = arith.constant dense<0.000000e+00> : vector<8x128xf32>
    %110 = tpu.matmul %107, %109, %cst_31 {dimension_numbers = #tpu.dot_dimension_numbers<[1], [0], [0], [1], [0, 0, 1, 1], [], []>} : vector<8x128xbf16>, vector<128x128xbf16>, vector<8x128xf32> -> vector<8x128xf32>
    %111 = arith.addf %100, %110 : vector<8x128xf32>
    %c0_32 = arith.constant 0 : index
    %c0_33 = arith.constant 0 : index
    %112 = vector.load %arg2[%c0_32, %c0_33] : memref<1x128xf32, #tpu.memory_space<vmem>>, vector<1x128xf32>
    %113 = vector.broadcast %112 : vector<1x128xf32> to vector<8x128xf32>
    %114 = arith.addf %111, %113 : vector<8x128xf32>
    %115 = arith.truncf %114 : vector<8x128xf32> to vector<8x128xbf16>
    %c0_34 = arith.constant 0 : index
    %c0_35 = arith.constant 0 : index
    %116 = vector.load %arg3[%c0_34, %c0_35] : memref<128x128xbf16, #tpu.memory_space<vmem>>, vector<128x128xbf16>
    %cst_36 = arith.constant dense<0.000000e+00> : vector<8x128xf32>
    %117 = tpu.matmul %115, %116, %cst_36 {dimension_numbers = #tpu.dot_dimension_numbers<[1], [0], [0], [1], [0, 0, 1, 1], [], []>} : vector<8x128xbf16>, vector<128x128xbf16>, vector<8x128xf32> -> vector<8x128xf32>
    %c0_37 = arith.constant 0 : index
    %c0_38 = arith.constant 0 : index
    %118 = vector.load %arg4[%c0_37, %c0_38] : memref<1x128xf32, #tpu.memory_space<vmem>>, vector<1x128xf32>
    %119 = vector.broadcast %118 : vector<1x128xf32> to vector<8x128xf32>
    %120 = arith.addf %117, %119 : vector<8x128xf32>
    %c0_39 = arith.constant 0 : index
    %c0_40 = arith.constant 0 : index
    %121 = vector.load %arg5[%c0_39, %c0_40] : memref<8x128xf32, #tpu.memory_space<vmem>>, vector<8x128xf32>
    tpu.vector_store %arg5[%c0_39, %c0_40], %120 {strides = array<i32>} : memref<8x128xf32, #tpu.memory_space<vmem>>, vector<8x128xf32>,
    return
  }
}

</mosaic_0001>

<bundles_post_ra>
// kernel: tpu_custom_call.1
= control target key start
LH: loop header
LB: loop body
LE: loop exit
PB: predicated region body
PF: predicated region fallthrough
CT: control target
= control target key end

     0   :  { %10 = vsyncpa [#allocation3], 0  ;;  %s2170_s0 = inlined_call_operand.hbm [shape: s32[8,10], index: 0, kind: input, shape index: {}]   ;;  %s2171_s1 = inlined_call_operand.hbm [shape: bf16[10,128,128], index: 1, kind: input, shape index: {}]   ;;  %s2172_s2 = inlined_call_operand.vmem [shape: f32[1,128], index: 2, kind: input, shape index: {}]   ;;  %s2173_s3 = inlined_call_operand.hbm [shape: bf16[128,128], index: 3, kind: input, shape index: {}]   ;;  %s2174_s4 = inlined_call_operand.vmem [shape: f32[1,128], index: 4, kind: input, shape index: {}]   ;;  %s2175_s5 = inlined_call_operand.hbm [shape: f32[8,128], index: 5, kind: output, shape index: {}]  }
   0x1   :  { %11 = vsyncpa [#allocation6], 0 }
   0x2   :  { %12 = vsyncpa [#allocation4], 0  ;;  %s1971_s18 = smov [#allocation5]  }
   0x3   :  { %s28_s19 = sshll.u32 %s1971_s18, 4  ;;  %s29_s19 = int_to_ptr.vmem [resolvable:$true] %s28_s19 }
   0x4   :  { %s1893_s20 = scalar_lea.vmem %s29_s19, 10240  ;;  %p1898_p1 = scmp.lt.s32.totalorder %s29_s19, %s29_s19 }
   0x5   :  { %p1894_p0 = scmp.ne.s32.totalorder %s29_s19, %s1893_s20  ;;  %p1899_p2 = scmp.lt.s32.totalorder %s1893_s20, %s1893_s20 }
   0x7   :  { %p1900_p3 = por %p1899_p2, %p1898_p1 }
   0x9   :  { %p1901_p4 = pnand %p1900_p3, %p1894_p0 }
   0xb   :  { %1904 = shalt.err (!%p1901_p4)
}
   0xc   :  { %s1972_s21 = smov 64   ;;  %s1973_s22 = smov 4  }
   0xd   :  { %34 = dma.hbm_to_vmem [thread:$0]  %s2171_s1, 10240, %s29_s19, [#allocation6], %s1972_s21, %s1972_s21, %s1973_s22  }
   0xe   :  { %s1974_s25 = smov [#allocation2]   ;;  %s1975_s27 = smov [#allocation7]  }
   0xf   :  { %s19_s26 = sshll.u32 %s1974_s25, 4  ;;  %s42_s28 = sshll.u32 %s1975_s27, 4  ;;  %s20_s26 = int_to_ptr.vmem [resolvable:$true] %s19_s26  ;;  %s43_s28 = int_to_ptr.vmem [resolvable:$true] %s42_s28 }
  0x10   :  { %s1913_s29 = scalar_lea.vmem %s20_s26, 128  ;;  %p1918_p6 = scmp.lt.s32.totalorder %s20_s26, %s20_s26 }
  0x11   :  { %p1914_p5 = scmp.ne.s32.totalorder %s20_s26, %s1913_s29  ;;  %p1919_p7 = scmp.lt.s32.totalorder %s1913_s29, %s1913_s29 }
  0x13   :  { %p1920_p8 = por %p1919_p7, %p1918_p6 }
  0x15   :  { %p1921_p9 = pnand %p1920_p8, %p1914_p5 }
  0x17   :  { %1924 = shalt.err (!%p1921_p9)
}
  0x18   :  { %22 = dma.hbm_to_vmem [thread:$0]  %s2170_s0, 128, %s20_s26, [#allocation3]  }
  0x19   :  { %s1933_s7 = scalar_lea.vmem %s43_s28, 1024  ;;  %p1938_p11 = scmp.lt.s32.totalorder %s43_s28, %s43_s28 }
  0x1a   :  { %p1934_p10 = scmp.ne.s32.totalorder %s43_s28, %s1933_s7  ;;  %p1939_p12 = scmp.lt.s32.totalorder %s1933_s7, %s1933_s7 }
  0x1c   :  { %p1940_p13 = por %p1939_p12, %p1938_p11 }
  0x1e   :  { %p1941_p0 = pnand %p1940_p13, %p1934_p10 }
  0x20   :  { %1944 = shalt.err (!%p1941_p0)
}
  0x21   :  { %48 = dma.hbm_to_vmem [thread:$0]  %s2173_s3, 1024, %s43_s28, [#allocation6], %s1972_s21, %s1972_s21, %s1973_s22  }
  0x22   :  { %1965 = dma.done.wait [#allocation3], 128  }
  0x23   :  { %1966 = vsyncadd [#allocation3], 4294967168 }
  0x24   :  { %1967 = dma.done.wait [#allocation6], 11264  }
  0x25   :  { %1968 = vsyncadd [#allocation6], 4294956032  ;;  %v1976_v0 = vmov 1   ;;  %v1977_v1 = vmov 2   ;;  %v1978_v2 = vmov 0.0   ;;  %vm1979_vm0 = vmmov 0  }
  0x26   :  { %1786 = vset.pattern.permute.xlu0 %v1976_v0  ;;  %1788 = vset.pattern.permute.xlu1 %v1977_v1  ;;  %v61_v3 = vld [vmem:[#allocation2] sm:$0xff]  ;;  %v1798_v5 = vld [vmem:[#allocation5 + $0x70] sm:$0xff]   ;;  %v1980_v7 = vmov 0   ;;  %v1981_v8 = vmov 3   ;;  %v1800_v9 = vld [vmem:[#allocation5 + $0x68] sm:$0xff]   ;;  %v1982_v11 = vmov 4   ;;  %v62_v28 = vlaneseq }
  0x27   :  { %1547 = vmatprep.subr.bf16.mxu0 %v1978_v2  ;;  %1567 = vmatprep.subr.bf16.mxu1 %v1978_v2  ;;  %v1797_v4 = vld [vmem:[#allocation5 + $0x78] sm:$0xff]   ;;  %v1801_v10 = vld [vmem:[#allocation5 + $0x30] sm:$0xff]   ;;  %v1983_v12 = vmov 5   ;;  %v1802_v13 = vld [vmem:[#allocation5 + $0x60] sm:$0xff]   ;;  %v1984_v15 = vmov 6   ;;  %v1985_v16 = vmov 8  }
  0x28   :  { %1563 = vmatprep.mubr.msk.bf16.mxu0 %vm1979_vm0, %v1978_v2  ;;  %1583 = vmatprep.mubr.msk.bf16.mxu1 %vm1979_vm0, %v1978_v2  ;;  %v1799_v6 = vld [vmem:[#allocation5 + $0x38] sm:$0xff]   ;;  %v1803_v14 = vld [vmem:[#allocation5 + $0x28] sm:$0xff]   ;;  %v1805_v18 = vld [vmem:[#allocation5 + $0x20] sm:$0xff]   ;;  %v1986_v19 = vmov 7   ;;  %v1987_v22 = vmov 9   ;;  %v2051_v29 = vand.u32 127, %v62_v28 }
  0x29   :  { %88 = vperm.xlu0 %1786, %v61_v3   ;;  %288 = vperm.xlu1 %1788, %v61_v3   ;;  %v1804_v17 = vld [vmem:[#allocation5 + $0x58] sm:$0xff]   ;;  %v1806_v20 = vld [vmem:[#allocation5 + $0x50] sm:$0xff]   ;;  %v1808_v23 = vld [vmem:[#allocation5 + $0x48] sm:$0xff]   ;;  %v1988_v32 = vmov 1.0|1.0   ;;  %s1989_s11 = smov [#allocation8]  }
  0x2a   :  { %1548 = vmatpush3.bf16.msra.mxu0 %v1797_v4  ;;  %1568 = vmatpush3.bf16.msra.mxu1 %v1799_v6  ;;  %v1807_v21 = vld [vmem:[#allocation5 + $0x18] sm:$0xff]   ;;  %v1809_v24 = vld [vmem:[#allocation5 + $0x10] sm:$0xff]   ;;  %v1810_v25 = vld [vmem:[#allocation5 + $0x40] sm:$0xff]   ;;  %s1318_s12 = sshll.u32 %s1989_s11, 4  ;;  %s1319_s12 = int_to_ptr.vmem [resolvable:$true] %s1318_s12 }
  0x2b   :  { %1549 = vmatprep.subr.bf16.mxu0 %v1978_v2  ;;  %1569 = vmatprep.subr.bf16.mxu1 %v1978_v2  ;;  %v1811_v26 = vld [vmem:[#allocation5 + $0x8] sm:$0xff]   ;;  %v1813_v27 = vld [vmem:[#allocation5] sm:$0xff]   ;;  %v1812_v31 = vld [vmem:[#allocation5 + $0xb8] sm:$0xff]   ;;  %p1950_p2 = scmp.lt.s32.totalorder %s1319_s12, %s1319_s12 }
  0x2c   :  { %v1814_v33 = vld [vmem:[#allocation5 + $0xb0] sm:$0xff]   ;;  %v1815_v35 = vld [vmem:[#allocation5 + $0xf8] sm:$0xff]   ;;  %v1816_v36 = vld [vmem:[#allocation5 + $0xa8] sm:$0xff]  }
  0x2d   :  { %1787 = vset.pattern.permute.xlu0 %v1980_v7  ;;  %1789 = vset.pattern.permute.xlu1 %v1981_v8  ;;  %v1817_v37 = vld [vmem:[#allocation5 + $0xf0] sm:$0xff]   ;;  %v1818_v38 = vld [vmem:[#allocation5 + $0xa0] sm:$0xff]   ;;  %v1819_v39 = vld [vmem:[#allocation5 + $0xe8] sm:$0xff]  }
  0x2e   :  { %65 = vperm.xlu0 %1787, %v61_v3   ;;  %401 = vperm.xlu1 %1789, %v61_v3   ;;  %v1820_v40 = vld [vmem:[#allocation5 + $0x98] sm:$0xff]   ;;  %v1821_v41 = vld [vmem:[#allocation5 + $0xe0] sm:$0xff]   ;;  %v1822_v42 = vld [vmem:[#allocation5 + $0x90] sm:$0xff]  }
  0x2f   :  { %1550 = vmatpush3.bf16.msra.mxu0 %v1798_v5  ;;  %1570 = vmatpush3.bf16.msra.mxu1 %v1801_v10  ;;  %v1823_v43 = vld [vmem:[#allocation5 + $0xd8] sm:$0xff]   ;;  %v1824_v44 = vld [vmem:[#allocation5 + $0x88] sm:$0xff]   ;;  %v1825_v45 = vld [vmem:[#allocation5 + $0xd0] sm:$0xff]  }
  0x30   :  { %1551 = vmatprep.subr.bf16.mxu0 %v1978_v2  ;;  %1571 = vmatprep.subr.bf16.mxu1 %v1978_v2  ;;  %v1826_v47 = vld [vmem:[#allocation5 + $0x80] sm:$0xff]   ;;  %v1827_v48 = vld [vmem:[#allocation5 + $0xc8] sm:$0xff]   ;;  %v1828_v50 = vld [vmem:[#allocation5 + $0x138] sm:$0xff]  }
  0x31   :  { %v1829_v51 = vld [vmem:[#allocation5 + $0xc0] sm:$0xff]   ;;  %v1830_v52 = vld [vmem:[#allocation5 + $0x130] sm:$0xff]   ;;  %v1831_v53 = vld [vmem:[#allocation5 + $0x178] sm:$0xff]  }
  0x32   :  { %1790 = vset.pattern.permute.xlu1 %v1982_v11  ;;  %1791 = vset.pattern.permute.xlu0 %v1983_v12  ;;  %v1832_v54 = vld [vmem:[#allocation5 + $0x128] sm:$0xff]   ;;  %v1833_v55 = vld [vmem:[#allocation5 + $0x170] sm:$0xff]   ;;  %v1834_v56 = vld [vmem:[#allocation5 + $0x120] sm:$0xff]  }
  0x33   :  { %514 = vperm.xlu1 %1790, %v61_v3   ;;  %627 = vperm.xlu0 %1791, %v61_v3   ;;  %v1835_v57 = vld [vmem:[#allocation5 + $0x168] sm:$0xff]   ;;  %v1836_v58 = vld [vmem:[#allocation5 + $0x118] sm:$0xff]   ;;  %v1837_v59 = vld [vmem:[#allocation5 + $0x160] sm:$0xff]  }
  0x34   :  { %1552 = vmatpush3.bf16.msra.mxu0 %v1800_v9  ;;  %1572 = vmatpush3.bf16.msra.mxu1 %v1803_v14  ;;  %v1838_v60 = vld [vmem:[#allocation5 + $0x110] sm:$0xff]   ;;  %v1839_v61 = vld [vmem:[#allocation5 + $0x158] sm:$0xff]   ;;  %v1840_v62 = vld [vmem:[#allocation5 + $0x108] sm:$0xff]  }
  0x35   :  { %1553 = vmatprep.subr.bf16.mxu0 %v1978_v2  ;;  %1573 = vmatprep.subr.bf16.mxu1 %v1978_v2  ;;  %v1841_v63 = vld [vmem:[#allocation5 + $0x150] sm:$0xff]   ;;  %v1842_v1 = vld [vmem:[#allocation5 + $0x100] sm:$0xff]   ;;  %v1844_v5 = vld [vmem:[#allocation5 + $0x1b8] sm:$0xff]  }
  0x36   :  { %v1845_v6 = vld [vmem:[#allocation5 + $0x140] sm:$0xff]   ;;  %v1846_v7 = vld [vmem:[#allocation5 + $0x1b0] sm:$0xff]   ;;  %v1847_v8 = vld [vmem:[#allocation5 + $0x1f8] sm:$0xff]  }
  0x37   :  { %1792 = vset.pattern.permute.xlu1 %v1984_v15  ;;  %1794 = vset.pattern.permute.xlu0 %v1985_v16  ;;  %v1848_v9 = vld [vmem:[#allocation5 + $0x1a8] sm:$0xff]   ;;  %v1849_v10 = vld [vmem:[#allocation5 + $0x1f0] sm:$0xff]   ;;  %v1850_v11 = vld [vmem:[#allocation5 + $0x1a0] sm:$0xff]  }
  0x38   :  { %740 = vperm.xlu1 %1792, %v61_v3   ;;  %1554 = vmatpush3.bf16.msra.mxu0 %v1802_v13  ;;  %v1851_v12 = vld [vmem:[#allocation5 + $0x1e8] sm:$0xff]   ;;  %v1852_v13 = vld [vmem:[#allocation5 + $0x198] sm:$0xff]   ;;  %v1853_v14 = vld [vmem:[#allocation5 + $0x1e0] sm:$0xff]  }
  0x39   :  { %1555 = vmatprep.subr.bf16.mxu0 %v1978_v2  ;;  %966 = vperm.xlu0 %1794, %v61_v3   ;;  %v1854_v15 = vld [vmem:[#allocation5 + $0x190] sm:$0xff]   ;;  %v1855_v16 = vld [vmem:[#allocation5 + $0x1d8] sm:$0xff]  }
  0x3a   :  { %1574 = vmatpush3.bf16.msra.mxu1 %v1805_v18  ;;  %v1857_v18 = vld [vmem:[#allocation5 + $0x1d0] sm:$0xff]  }
  0x3b   :  { %1575 = vmatprep.subr.bf16.mxu1 %v1978_v2  ;;  %v1865_v28 = vld [vmem:[#allocation5 + $0x270] sm:$0xff]  }
  0x3c   :  { %1793 = vset.pattern.permute.xlu1 %v1986_v19  ;;  %1556 = vmatpush3.bf16.msra.mxu0 %v1804_v17  ;;  %v1856_v17 = vld [vmem:[#allocation5 + $0x188] sm:$0xff]  }
  0x3d   :  { %853 = vperm.xlu1 %1793, %v61_v3   ;;  %1557 = vmatprep.subr.bf16.mxu0 %v1978_v2 }
  0x3e   :  { %1796 = vset.pattern.permute.xlu0 %v1987_v22  ;;  %1576 = vmatpush3.bf16.msra.mxu1 %v1807_v21  ;;  %v1859_v21 = vld [vmem:[#allocation5 + $0x1c8] sm:$0xff]  }
  0x3f   :  { %1577 = vmatprep.subr.bf16.mxu1 %v1978_v2 }
  0x40   :  { %1558 = vmatpush3.bf16.msra.mxu0 %v1806_v20  ;;  %v1858_v20 = vld [vmem:[#allocation5 + $0x180] sm:$0xff]  }
  0x41   :  { %1559 = vmatprep.subr.bf16.mxu0 %v1978_v2  ;;  %1795 = vset.pattern.permute.xlu1 %v1987_v22 }
  0x42   :  { %1079 = vperm.xlu1 %1795, %v61_v3   ;;  %1578 = vmatpush3.bf16.msra.mxu1 %v1809_v24  ;;  %v1843_v3 = vld [vmem:[#allocation5 + $0x148] sm:$0xff]   ;;  %v1861_v24 = vld [vmem:[#allocation5 + $0x1c0] sm:$0xff]  }
  0x43   :  { %1579 = vmatprep.subr.bf16.mxu1 %v1978_v2 }
  0x44   :  { %1560 = vmatpush3.bf16.msra.mxu0 %v1808_v23  ;;  %v1860_v23 = vld [vmem:[#allocation5 + $0x238] sm:$0xff]  }
  0x45   :  { %1561 = vmatprep.subr.bf16.mxu0 %v1978_v2 }
  0x46   :  { %1580 = vmatpush3.bf16.msra.mxu1 %v1811_v26  ;;  %v1863_v26 = vld [vmem:[#allocation5 + $0x278] sm:$0xff]  }
  0x47   :  { %1581 = vmatprep.subr.bf16.mxu1 %v1978_v2 }
  0x48   :  { %1562 = vmatpush3.bf16.msra.mxu0 %v1810_v25  ;;  %v1862_v25 = vld [vmem:[#allocation5 + $0x230] sm:$0xff]  }
  0x49   :  { %1587 = vmatprep.subr.bf16.mxu0 %v1978_v2 }
  0x4a   :  { %1582 = vmatpush3.bf16.msra.mxu1 %v1813_v27  ;;  %v1864_v27 = vld [vmem:[#allocation5 + $0x228] sm:$0xff]  }
  0x4b   :  { %1607 = vmatprep.subr.bf16.mxu1 %v1978_v2 }
  0xa4   :  { %v89_v30 = vpop.permute.xlu0 %88  ;;  %v289_v46 = vpop.permute.xlu1 %288 }
  0xa5   :  { %vm90_vm1 = vcmp.eq.s32.totalorder %v89_v30, %v2051_v29  ;;  %vm290_vm5 = vcmp.eq.s32.totalorder %v289_v46, %v2051_v29  ;;  %v1866_v30 = vld [vmem:[#allocation5 + $0x220] sm:$0xff]   ;;  %v1879_v46 = vld [vmem:[#allocation7 + $0x28] sm:$0xff]  }
  0xa6   :  { %vm1338_vm2 = vmpackc.low %vm90_vm1, %vm90_vm1 }
  0xa7   :  { %1564 = vmatmul.mubr.msk.bf16.vlgmr.msra.gmra.mxu0 %vm1338_vm2, %v1988_v32  ;;  %vm1359_vm6 = vmpackc.low %vm290_vm5, %vm290_vm5 }
  0xa8   :  { %1588 = vmatpush3.bf16.msra.mxu0 %v1812_v31  ;;  %1603 = vmatprep.mubr.msk.bf16.mxu0 %vm1979_vm0, %v1978_v2  ;;  %v1867_v31 = vld [vmem:[#allocation5 + $0x268] sm:$0xff]  }
  0xa9   :  { %v66_v34 = vpop.permute.xlu0 %65  ;;  %1589 = vmatprep.subr.bf16.mxu0 %v1978_v2  ;;  %v402_v49 = vpop.permute.xlu1 %401 }
  0xaa   :  { %vm67_vm3 = vcmp.eq.s32.totalorder %v66_v34, %v2051_v29  ;;  %vm403_vm7 = vcmp.eq.s32.totalorder %v402_v49, %v2051_v29  ;;  %v1869_v34 = vld [vmem:[#allocation5 + $0x260] sm:$0xff]  }
  0xab   :  { %vm1348_vm4 = vmpackc.low %vm67_vm3, %vm67_vm3 }
  0xac   :  { %1590 = vmatpush3.bf16.msra.mxu0 %v1814_v33  ;;  %1584 = vmatmul.mubr.msk.bf16.vlgmr.msra.gmra.mxu1 %vm1348_vm4, %v1988_v32  ;;  %vm1370_vm8 = vmpackc.low %vm403_vm7, %vm403_vm7  ;;  %v1868_v33 = vld [vmem:[#allocation5 + $0x218] sm:$0xff]  }
  0xad   :  { %1608 = vmatpush3.bf16.msra.mxu1 %v1815_v35  ;;  %1591 = vmatprep.subr.bf16.mxu0 %v1978_v2  ;;  %v1870_v35 = vld [vmem:[#allocation5 + $0x210] sm:$0xff]  }
  0xae   :  { %1609 = vmatprep.subr.bf16.mxu1 %v1978_v2  ;;  %1623 = vmatprep.mubr.msk.bf16.mxu1 %vm1979_vm0, %v1978_v2  ;;  %v515_v0 = vpop.permute.xlu1 %514  ;;  %v628_v4 = vpop.permute.xlu0 %627 }
  0xaf   :  { %vm516_vm9 = vcmp.eq.s32.totalorder %v515_v0, %v2051_v29  ;;  %vm629_vm11 = vcmp.eq.s32.totalorder %v628_v4, %v2051_v29 }
  0xb0   :  { %1592 = vmatpush3.bf16.msra.mxu0 %v1816_v36  ;;  %vm1381_vm10 = vmpackc.low %vm516_vm9, %vm516_vm9  ;;  %v1871_v36 = vld [vmem:[#allocation5 + $0x258] sm:$0xff]  }
  0xb1   :  { %1610 = vmatpush3.bf16.msra.mxu1 %v1817_v37  ;;  %1593 = vmatprep.subr.bf16.mxu0 %v1978_v2  ;;  %vm1392_vm12 = vmpackc.low %vm629_vm11, %vm629_vm11  ;;  %v1872_v37 = vld [vmem:[#allocation5 + $0x208] sm:$0xff]  }
  0xb2   :  { %1611 = vmatprep.subr.bf16.mxu1 %v1978_v2 }
  0xb3   :  { %v741_v19 = vpop.permute.xlu1 %740 }
  0xb4   :  { %1594 = vmatpush3.bf16.msra.mxu0 %v1818_v38  ;;  %vm742_vm13 = vcmp.eq.s32.totalorder %v741_v19, %v2051_v29  ;;  %v1873_v38 = vld [vmem:[#allocation5 + $0x250] sm:$0xff]  }
  0xb5   :  { %1612 = vmatpush3.bf16.msra.mxu1 %v1819_v39  ;;  %1595 = vmatprep.subr.bf16.mxu0 %v1978_v2  ;;  %vm1403_vm14 = vmpackc.low %vm742_vm13, %vm742_vm13  ;;  %v967_v39 = vpop.permute.xlu0 %966 }
  0xb6   :  { %1613 = vmatprep.subr.bf16.mxu1 %v1978_v2  ;;  %vm968_vm2 = vcmp.eq.s32.totalorder %v967_v39, %v2051_v29 }
  0xb7   :  { %vm1425_vm3 = vmpackc.low %vm968_vm2, %vm968_vm2 }
  0xb8   :  { %1596 = vmatpush3.bf16.msra.mxu0 %v1820_v40  ;;  %v854_v22 = vpop.permute.xlu1 %853  ;;  %v1874_v40 = vld [vmem:[#allocation5 + $0x200] sm:$0xff]  }
  0xb9   :  { %1614 = vmatpush3.bf16.msra.mxu1 %v1821_v41  ;;  %1597 = vmatprep.subr.bf16.mxu0 %v1978_v2  ;;  %vm855_vm15 = vcmp.eq.s32.totalorder %v854_v22, %v2051_v29  ;;  %v1875_v41 = vld [vmem:[#allocation5 + $0x248] sm:$0xff]  }
  0xba   :  { %1615 = vmatprep.subr.bf16.mxu1 %v1978_v2  ;;  %vm1414_vm1 = vmpackc.low %vm855_vm15, %vm855_vm15 }
  0xbc   :  { %1598 = vmatpush3.bf16.msra.mxu0 %v1822_v42 }
  0xbd   :  { %1616 = vmatpush3.bf16.msra.mxu1 %v1823_v43  ;;  %1599 = vmatprep.subr.bf16.mxu0 %v1978_v2  ;;  %v1080_v42 = vpop.permute.xlu1 %1079  ;;  %v1876_v43 = vld [vmem:[#allocation5 + $0x240] sm:$0xff]  }
  0xbe   :  { %1617 = vmatprep.subr.bf16.mxu1 %v1978_v2  ;;  %vm1081_vm4 = vcmp.eq.s32.totalorder %v1080_v42, %v2051_v29  ;;  %v1880_v29 = vld [vmem:[#allocation7 + $0x20] sm:$0xff]  }
  0xbf   :  { %vm1436_vm5 = vmpackc.low %vm1081_vm4, %vm1081_vm4 }
  0xc0   :  { %1600 = vmatpush3.bf16.msra.mxu0 %v1824_v44  ;;  %v1877_v44 = vld [vmem:[#allocation7 + $0x38] sm:$0xff]  }
  0xc1   :  { %1618 = vmatpush3.bf16.msra.mxu1 %v1825_v45  ;;  %1601 = vmatprep.subr.bf16.mxu0 %v1978_v2  ;;  %v1878_v45 = vld [vmem:[#allocation7 + $0x30] sm:$0xff]  }
  0xc2   :  { %1619 = vmatprep.subr.bf16.mxu1 %v1978_v2 }
  0xc4   :  { %1602 = vmatpush3.bf16.msra.mxu0 %v1826_v47  ;;  %v1881_v47 = vld [vmem:[#allocation7 + $0x18] sm:$0xff]  }
  0xc5   :  { %1620 = vmatpush3.bf16.msra.mxu1 %v1827_v48  ;;  %1627 = vmatprep.subr.bf16.mxu0 %v1978_v2 }
  0xc6   :  { %1621 = vmatprep.subr.bf16.mxu1 %v1978_v2 }
  0xc7   :  { %1604 = vmatmul.mubr.msk.bf16.vlgmr.msra.gmra.mxu0 %vm1359_vm6, %v1988_v32 }
  0xc8   :  { %1628 = vmatpush3.bf16.msra.mxu0 %v1828_v50  ;;  %1643 = vmatprep.mubr.msk.bf16.mxu0 %vm1979_vm0, %v1978_v2  ;;  %v1883_v50 = vld [vmem:[#allocation7 + $0x8] sm:$0xff]  }
  0xc9   :  { %1622 = vmatpush3.bf16.msra.mxu1 %v1829_v51  ;;  %1629 = vmatprep.subr.bf16.mxu0 %v1978_v2 }
  0xca   :  { %1647 = vmatprep.subr.bf16.mxu1 %v1978_v2 }
  0xcc   :  { %1624 = vmatmul.mubr.msk.bf16.vlgmr.msra.gmra.mxu1 %vm1370_vm8, %v1988_v32  ;;  %1630 = vmatpush3.bf16.msra.mxu0 %v1830_v52 }
  0xcd   :  { %1648 = vmatpush3.bf16.msra.mxu1 %v1831_v53  ;;  %1631 = vmatprep.subr.bf16.mxu0 %v1978_v2 }
  0xce   :  { %1649 = vmatprep.subr.bf16.mxu1 %v1978_v2  ;;  %1663 = vmatprep.mubr.msk.bf16.mxu1 %vm1979_vm0, %v1978_v2 }
  0xd0   :  { %1632 = vmatpush3.bf16.msra.mxu0 %v1832_v54 }
  0xd1   :  { %1650 = vmatpush3.bf16.msra.mxu1 %v1833_v55  ;;  %1633 = vmatprep.subr.bf16.mxu0 %v1978_v2 }
  0xd2   :  { %1651 = vmatprep.subr.bf16.mxu1 %v1978_v2 }
  0xd4   :  { %1634 = vmatpush3.bf16.msra.mxu0 %v1834_v56  ;;  %v1884_v56 = vld [vmem:[#allocation7] sm:$0xff]  }
  0xd5   :  { %1652 = vmatpush3.bf16.msra.mxu1 %v1835_v57  ;;  %1635 = vmatprep.subr.bf16.mxu0 %v1978_v2 }
  0xd6   :  { %1653 = vmatprep.subr.bf16.mxu1 %v1978_v2 }
  0xd8   :  { %1636 = vmatpush3.bf16.msra.mxu0 %v1836_v58 }
  0xd9   :  { %1654 = vmatpush3.bf16.msra.mxu1 %v1837_v59  ;;  %1637 = vmatprep.subr.bf16.mxu0 %v1978_v2 }
  0xda   :  { %1655 = vmatprep.subr.bf16.mxu1 %v1978_v2 }
  0xdc   :  { %1638 = vmatpush3.bf16.msra.mxu0 %v1838_v60 }
  0xdd   :  { %1656 = vmatpush3.bf16.msra.mxu1 %v1839_v61  ;;  %1639 = vmatprep.subr.bf16.mxu0 %v1978_v2 }
  0xde   :  { %1657 = vmatprep.subr.bf16.mxu1 %v1978_v2 }
  0xe0   :  { %1640 = vmatpush3.bf16.msra.mxu0 %v1840_v62 }
  0xe1   :  { %1658 = vmatpush3.bf16.msra.mxu1 %v1841_v63  ;;  %1641 = vmatprep.subr.bf16.mxu0 %v1978_v2 }
  0xe2   :  { %1659 = vmatprep.subr.bf16.mxu1 %v1978_v2 }
  0xe4   :  { %1642 = vmatpush3.bf16.msra.mxu0 %v1842_v1 }
  0xe5   :  { %1660 = vmatpush3.bf16.msra.mxu1 %v1843_v3  ;;  %1667 = vmatprep.subr.bf16.mxu0 %v1978_v2 }
  0xe6   :  { %1661 = vmatprep.subr.bf16.mxu1 %v1978_v2 }
  0xe7   :  { %1644 = vmatmul.mubr.msk.bf16.vlgmr.msra.gmra.mxu0 %vm1381_vm10, %v1988_v32 }
  0xe8   :  { %1668 = vmatpush3.bf16.msra.mxu0 %v1844_v5  ;;  %1683 = vmatprep.mubr.msk.bf16.mxu0 %vm1979_vm0, %v1978_v2 }
  0xe9   :  { %1662 = vmatpush3.bf16.msra.mxu1 %v1845_v6  ;;  %1669 = vmatprep.subr.bf16.mxu0 %v1978_v2 }
  0xea   :  { %1687 = vmatprep.subr.bf16.mxu1 %v1978_v2 }
  0xec   :  { %1664 = vmatmul.mubr.msk.bf16.vlgmr.msra.gmra.mxu1 %vm1392_vm12, %v1988_v32  ;;  %1670 = vmatpush3.bf16.msra.mxu0 %v1846_v7 }
  0xed   :  { %1688 = vmatpush3.bf16.msra.mxu1 %v1847_v8  ;;  %1671 = vmatprep.subr.bf16.mxu0 %v1978_v2 }
  0xee   :  { %1689 = vmatprep.subr.bf16.mxu1 %v1978_v2  ;;  %1703 = vmatprep.mubr.msk.bf16.mxu1 %vm1979_vm0, %v1978_v2 }
  0xf0   :  { %1672 = vmatpush3.bf16.msra.mxu0 %v1848_v9 }
  0xf1   :  { %1690 = vmatpush3.bf16.msra.mxu1 %v1849_v10  ;;  %1673 = vmatprep.subr.bf16.mxu0 %v1978_v2 }
  0xf2   :  { %1691 = vmatprep.subr.bf16.mxu1 %v1978_v2 }
  0xf4   :  { %1674 = vmatpush3.bf16.msra.mxu0 %v1850_v11 }
  0xf5   :  { %1692 = vmatpush3.bf16.msra.mxu1 %v1851_v12  ;;  %1675 = vmatprep.subr.bf16.mxu0 %v1978_v2 }
  0xf6   :  { %1693 = vmatprep.subr.bf16.mxu1 %v1978_v2 }
  0xf8   :  { %1676 = vmatpush3.bf16.msra.mxu0 %v1852_v13 }
  0xf9   :  { %1694 = vmatpush3.bf16.msra.mxu1 %v1853_v14  ;;  %1677 = vmatprep.subr.bf16.mxu0 %v1978_v2 }
  0xfa   :  { %1695 = vmatprep.subr.bf16.mxu1 %v1978_v2 }
  0xfc   :  { %1678 = vmatpush3.bf16.msra.mxu0 %v1854_v15 }
  0xfd   :  { %1696 = vmatpush3.bf16.msra.mxu1 %v1855_v16  ;;  %1679 = vmatprep.subr.bf16.mxu0 %v1978_v2 }
  0xfe   :  { %1697 = vmatprep.subr.bf16.mxu1 %v1978_v2 }
 0x100   :  { %1680 = vmatpush3.bf16.msra.mxu0 %v1856_v17 }
 0x101   :  { %1698 = vmatpush3.bf16.msra.mxu1 %v1857_v18  ;;  %1681 = vmatprep.subr.bf16.mxu0 %v1978_v2 }
 0x102   :  { %1699 = vmatprep.subr.bf16.mxu1 %v1978_v2 }
 0x104   :  { %1682 = vmatpush3.bf16.msra.mxu0 %v1858_v20 }
 0x105   :  { %1700 = vmatpush3.bf16.msra.mxu1 %v1859_v21  ;;  %1707 = vmatprep.subr.bf16.mxu0 %v1978_v2 }
 0x106   :  { %1701 = vmatprep.subr.bf16.mxu1 %v1978_v2 }
 0x107   :  { %1684 = vmatmul.mubr.msk.bf16.vlgmr.msra.gmra.mxu0 %vm1403_vm14, %v1988_v32 }
 0x108   :  { %1708 = vmatpush3.bf16.msra.mxu0 %v1860_v23  ;;  %1723 = vmatprep.mubr.msk.bf16.mxu0 %vm1979_vm0, %v1978_v2 }
 0x109   :  { %1702 = vmatpush3.bf16.msra.mxu1 %v1861_v24  ;;  %1709 = vmatprep.subr.bf16.mxu0 %v1978_v2 }
 0x10a   :  { %1727 = vmatprep.subr.bf16.mxu1 %v1978_v2 }
 0x10c   :  { %1704 = vmatmul.mubr.msk.bf16.vlgmr.msra.gmra.mxu1 %vm1414_vm1, %v1988_v32  ;;  %1710 = vmatpush3.bf16.msra.mxu0 %v1862_v25 }
 0x10d   :  { %1728 = vmatpush3.bf16.msra.mxu1 %v1863_v26  ;;  %1711 = vmatprep.subr.bf16.mxu0 %v1978_v2 }
 0x10e   :  { %1729 = vmatprep.subr.bf16.mxu1 %v1978_v2  ;;  %1743 = vmatprep.mubr.msk.bf16.mxu1 %vm1979_vm0, %v1978_v2 }
 0x110   :  { %1712 = vmatpush3.bf16.msra.mxu0 %v1864_v27 }
 0x111   :  { %1730 = vmatpush3.bf16.msra.mxu1 %v1865_v28  ;;  %1713 = vmatprep.subr.bf16.mxu0 %v1978_v2 }
 0x112   :  { %1731 = vmatprep.subr.bf16.mxu1 %v1978_v2 }
 0x114   :  { %1714 = vmatpush3.bf16.msra.mxu0 %v1866_v30 }
 0x115   :  { %1732 = vmatpush3.bf16.msra.mxu1 %v1867_v31  ;;  %1715 = vmatprep.subr.bf16.mxu0 %v1978_v2  ;;  %v1438_v31 = vld [vmem:[%s2172_s2] ss:$0 sm:$0xff]  ;;  %s1945_s2 = scalar_lea.vmem %s1319_s12, 128 }
 0x116   :  { %1733 = vmatprep.subr.bf16.mxu1 %v1978_v2  ;;  %p1946_p1 = scmp.ne.s32.totalorder %s1319_s12, %s1945_s2  ;;  %p1951_p3 = scmp.lt.s32.totalorder %s1945_s2, %s1945_s2 }
 0x118   :  { %1716 = vmatpush3.bf16.msra.mxu0 %v1868_v33  ;;  %p1952_p4 = por %p1951_p3, %p1950_p2 }
 0x119   :  { %1734 = vmatpush3.bf16.msra.mxu1 %v1869_v34  ;;  %1717 = vmatprep.subr.bf16.mxu0 %v1978_v2 }
 0x11a   :  { %1735 = vmatprep.subr.bf16.mxu1 %v1978_v2  ;;  %p1953_p5 = pnand %p1952_p4, %p1946_p1 }
 0x11c   :  { %1718 = vmatpush3.bf16.msra.mxu0 %v1870_v35 }
 0x11d   :  { %1736 = vmatpush3.bf16.msra.mxu1 %v1871_v36  ;;  %1719 = vmatprep.subr.bf16.mxu0 %v1978_v2 }
 0x11e   :  { %1737 = vmatprep.subr.bf16.mxu1 %v1978_v2 }
 0x120   :  { %1720 = vmatpush3.bf16.msra.mxu0 %v1872_v37 }
 0x121   :  { %1738 = vmatpush3.bf16.msra.mxu1 %v1873_v38  ;;  %1721 = vmatprep.subr.bf16.mxu0 %v1978_v2 }
 0x122   :  { %1739 = vmatprep.subr.bf16.mxu1 %v1978_v2 }
 0x124   :  { %1722 = vmatpush3.bf16.msra.mxu0 %v1874_v40  ;;  %v1439_v40 = vld [vmem:[%s2174_s4] ss:$0 sm:$0xff] }
 0x125   :  { %1740 = vmatpush3.bf16.msra.mxu1 %v1875_v41  ;;  %1747 = vmatprep.subr.bf16.mxu0 %v1978_v2 }
 0x126   :  { %1741 = vmatprep.subr.bf16.mxu1 %v1978_v2 }
 0x127   :  { %1724 = vmatmul.mubr.msk.bf16.vlgmr.msra.gmra.mxu0 %vm1425_vm3, %v1988_v32 }
 0x128   :  { %1763 = vmatprep.mubr.msk.bf16.mxu0 %vm1979_vm0, %v1978_v2  ;;  %1748 = vmatpush3.bf16.msra.mxu0 %v1877_v44 }
 0x129   :  { %1742 = vmatpush3.bf16.msra.mxu1 %v1876_v43  ;;  %1749 = vmatprep.subr.bf16.mxu0 %v1978_v2 }
 0x12c   :  { %1744 = vmatmul.mubr.msk.bf16.vlgmr.msra.gmra.mxu1 %vm1436_vm5, %v1988_v32  ;;  %1750 = vmatpush3.bf16.msra.mxu0 %v1878_v45  ;;  %v1882_v32 = vld [vmem:[#allocation7 + $0x10] sm:$0xff]  }
 0x12d   :  { %1751 = vmatprep.subr.bf16.mxu0 %v1978_v2 }
 0x130   :  { %1752 = vmatpush3.bf16.msra.mxu0 %v1879_v46 }
 0x131   :  { %1753 = vmatprep.subr.bf16.mxu0 %v1978_v2 }
 0x134   :  { %1754 = vmatpush3.bf16.msra.mxu0 %v1880_v29 }
 0x135   :  { %1755 = vmatprep.subr.bf16.mxu0 %v1978_v2 }
 0x138   :  { %1756 = vmatpush3.bf16.msra.mxu0 %v1881_v47 }
 0x139   :  { %1757 = vmatprep.subr.bf16.mxu0 %v1978_v2 }
 0x13c   :  { %1758 = vmatpush3.bf16.msra.mxu0 %v1882_v32 }
 0x13d   :  { %1759 = vmatprep.subr.bf16.mxu0 %v1978_v2 }
 0x140   :  { %1760 = vmatpush3.bf16.msra.mxu0 %v1883_v50 }
 0x141   :  { %1761 = vmatprep.subr.bf16.mxu0 %v1978_v2 }
 0x144   :  { %1762 = vmatpush3.bf16.msra.mxu0 %v1884_v56 }
 0x167   :  { %v193_v48 = vpop.f32.mrf.mxu0 }
 0x169   :  { %v1565_v49 = vpop.f32.mrf.mxu0 }
 0x16b   :  { %v196_v51 = vpop.f32.mrf.mxu0 }
 0x16c   :  { %v281_v52 = vpop.f32.mrf.mxu1 }
 0x16d   :  { %v282_v53 = vadd.f32 %v281_v52, %v193_v48  ;;  %v1566_v54 = vpop.f32.mrf.mxu0 }
 0x16e   :  { %v1585_v55 = vpop.f32.mrf.mxu1 }
 0x170   :  { %v284_v57 = vpop.f32.mrf.mxu1 }
 0x172   :  { %v1586_v58 = vpop.f32.mrf.mxu1 }
 0x187   :  { %v393_v59 = vpop.f32.mrf.mxu0 }
 0x188   :  { %v399_v60 = vadd.f32 %v393_v59, %v282_v53 }
 0x189   :  { %v1605_v61 = vpop.f32.mrf.mxu0 }
 0x18b   :  { %v396_v62 = vpop.f32.mrf.mxu0 }
 0x18c   :  { %v506_v63 = vpop.f32.mrf.mxu1 }
 0x18d   :  { %v512_v0 = vadd.f32 %v506_v63, %v399_v60  ;;  %v1606_v1 = vpop.f32.mrf.mxu0 }
 0x18e   :  { %v1625_v3 = vpop.f32.mrf.mxu1 }
 0x190   :  { %v509_v4 = vpop.f32.mrf.mxu1 }
 0x192   :  { %v1626_v5 = vpop.f32.mrf.mxu1 }
 0x1a7   :  { %v619_v6 = vpop.f32.mrf.mxu0 }
 0x1a8   :  { %v625_v21 = vadd.f32 %v619_v6, %v512_v0 }
 0x1a9   :  { %v1645_v7 = vpop.f32.mrf.mxu0 }
 0x1ab   :  { %v622_v8 = vpop.f32.mrf.mxu0 }
 0x1ac   :  { %v732_v9 = vpop.f32.mrf.mxu1 }
 0x1ad   :  { %v1646_v2 = vpop.f32.mrf.mxu0  ;;  %v738_v22 = vadd.f32 %v732_v9, %v625_v21 }
 0x1ae   :  { %v1665_v10 = vpop.f32.mrf.mxu1 }
 0x1b0   :  { %v735_v11 = vpop.f32.mrf.mxu1 }
 0x1b2   :  { %v1666_v12 = vpop.f32.mrf.mxu1 }
 0x1c7   :  { %v845_v13 = vpop.f32.mrf.mxu0 }
 0x1c8   :  { %v851_v23 = vadd.f32 %v845_v13, %v738_v22 }
 0x1c9   :  { %v1685_v14 = vpop.f32.mrf.mxu0 }
 0x1cb   :  { %v848_v15 = vpop.f32.mrf.mxu0 }
 0x1cc   :  { %v958_v16 = vpop.f32.mrf.mxu1 }
 0x1cd   :  { %v1686_v17 = vpop.f32.mrf.mxu0  ;;  %v964_v25 = vadd.f32 %v958_v16, %v851_v23 }
 0x1ce   :  { %v1705_v18 = vpop.f32.mrf.mxu1 }
 0x1d0   :  { %v961_v19 = vpop.f32.mrf.mxu1 }
 0x1d2   :  { %v1706_v20 = vpop.f32.mrf.mxu1 }
 0x1e7   :  { %v1071_v24 = vpop.f32.mrf.mxu0 }
 0x1e8   :  { %v1077_v27 = vadd.f32 %v1071_v24, %v964_v25 }
 0x1e9   :  { %v1725_v26 = vpop.f32.mrf.mxu0 }
 0x1eb   :  { %v1074_v28 = vpop.f32.mrf.mxu0 }
 0x1ec   :  { %v1184_v30 = vpop.f32.mrf.mxu1 }
 0x1ed   :  { %v1190_v33 = vadd.f32 %v1184_v30, %v1077_v27  ;;  %v1726_v34 = vpop.f32.mrf.mxu0 }
 0x1ee   :  { %v1745_v35 = vpop.f32.mrf.mxu1 }
 0x1ef   :  { %v1198_v36 = vadd.f32 %v1438_v31, %v1190_v33 }
 0x1f0   :  { %v1187_v37 = vpop.f32.mrf.mxu1 }
 0x1f1   :  { %v1199_v38 = vpack.c.bf16 %v1198_v36, %v1198_v36 }
 0x1f2   :  { %v1746_v39 = vpop.f32.mrf.mxu1 }
 0x1f3   :  { %1764 = vmatmul.mubr.bf16.vlgmr.msra.gmra.mxu0 %v1199_v38 }
 0x2b3   :  { %v1305_v41 = vpop.f32.mrf.mxu0 }
 0x2b4   :  { %v1306_v42 = vadd.f32 %v1439_v40, %v1305_v41 }
 0x2b5   :  { %v1765_v43 = vpop.f32.mrf.mxu0 }
 0x2b6   :  { %1311 = vst [vmem:[#allocation8] sm:$0xff] %v1306_v42 }
 0x2b7   :  { %v1308_v44 = vpop.f32.mrf.mxu0 }
 0x2b8   :  { %1956 = shalt.err (!%p1953_p5)
}
 0x2b9   :  { %1321 = dma.vmem_to_hbm [thread:$0]  %s1319_s12, 128, %s2175_s5, [#allocation4]   ;;  %v1766_v45 = vpop.f32.mrf.mxu0 }
 0x2ba   :  { %1969 = dma.done.wait [#allocation4], 128  }
 0x2bb   :  { %1970 = vsyncadd [#allocation4], 4294967168 }
 0x2bc   :  { %1325 = vsyncpa [#allocation3], 1 }
 0x2bd   :  { %1326 = vsyncpa [#allocation6], 1 }
 0x2be   :  { %1327 = vsyncpa [#allocation4], 1 }

</bundles_post_ra>
